<compile_context>
chip_gen: v7x
topology: tpu7x:2x2x1
jax: 0.10.0
libtpu: 0.0.40
codegen_flags: <defaults>
</compile_context>

<pallas_src>
import functools

import jax
import jax.numpy as jnp
from jax import lax
from jax.experimental import pallas as pl
from jax.experimental.pallas import tpu as pltpu


def _shift_kernel(shift_ref, x_ref, out_ref, *, pad, block, c, h, w):
    """One grid step = `block` consecutive batch images.

    shift_ref : SMEM (2*N,) int32, [2b] = x-shift (width), [2b+1] = y-shift (height).
    x_ref     : VMEM (block, C, H, W) input block (auto-pipelined).
    out_ref   : VMEM (block, C, H, W) output block.
    """
    g = pl.program_id(0)
    base = g * block

    # One-hot matrices in the input dtype (bf16 stays bf16 -> native MXU rate;
    # anything else computes in f32).
    mat_dtype = jnp.bfloat16 if x_ref.dtype == jnp.bfloat16 else jnp.float32

    # Shift-independent iota tables, hoisted out of the per-image loop
    # (JAX does not CSE broadcast_in_dim).
    i_ids = lax.broadcasted_iota(jnp.int32, (h, h), 0)   # output row index
    r_ids = lax.broadcasted_iota(jnp.int32, (h, h), 1)   # source row index
    j_ids = lax.broadcasted_iota(jnp.int32, (w, w), 1)   # output col index
    m_ids = lax.broadcasted_iota(jnp.int32, (w, w), 0)   # source col index

    for k in range(block):
        sx = shift_ref[2 * (base + k)]        # width shift  in [0, 2*pad]
        sy = shift_ref[2 * (base + k) + 1]    # height shift in [0, 2*pad]
        dy = sy - pad                          # vertical shift   in [-pad, pad]
        dx = sx - pad                          # horizontal shift in [-pad, pad]

        # One-hot clamp-shift selection matrices (ride the otherwise idle MXU):
        #   (R @ img)[i, :] = img[clamp(i + dy, 0, h-1), :]
        #   (img @ S)[:, j] = img[:, clamp(j + dx, 0, w-1)]
        R = (r_ids == jnp.clip(i_ids + dy, 0, h - 1)).astype(mat_dtype)
        S = (m_ids == jnp.clip(j_ids + dx, 0, w - 1)).astype(mat_dtype)

        # Column clamp-shift, fused across channels: one (c*h, w) @ (w, w) matmul.
        img2d = x_ref[k].reshape(c * h, w)
        cols = jnp.dot(img2d, S, preferred_element_type=jnp.float32)
        cols = cols.astype(mat_dtype).reshape(c, h, w)   # exact (one-hot selection)

        # Row clamp-shift per channel: c small (h, h) @ (h, w) matmuls.
        shifted = jnp.stack(
            [jnp.dot(R, cols[ci], preferred_element_type=jnp.float32)
             for ci in range(c)],
            axis=0,
        )

        # Single store per image.
        out_ref[k] = shifted.astype(out_ref.dtype)


def random_shifts_aug(x, shifts, pad, *, block=None):
    """x: (N, C, H, W) float; shifts: (N, 2) int32 in [0, 2*pad] ([:, 0]=x, [:, 1]=y)."""
    n, c, h, w = x.shape
    assert h == w
    assert jnp.issubdtype(x.dtype, jnp.floating), "images must be floating point"

    # Flat 1-D SMEM shift table: [sx0, sy0, sx1, sy1, ...].
    shifts_flat = jnp.asarray(shifts, jnp.int32).reshape(-1)

    if block is None:
        # Largest block whose double-buffered working set (2x in + 2x out)
        # stays well inside the scoped-VMEM limit on every TPU generation
        # (v7x has only 64 MiB physical VMEM), while keeping >= 2 grid steps
        # so the "parallel" batch axis can be sharded across TensorCores.
        img_bytes = c * h * w * x.dtype.itemsize
        budget = 16 * 1024 * 1024
        block = 1
        for cand in (32, 16, 8, 4, 2):
            if n % cand == 0 and n // cand >= 2 and 4 * cand * img_bytes <= budget:
                block = cand
                break
    assert n % block == 0

    flops = 2 * n * c * h * w * (w + h)                      # selection matmuls
    bytes_accessed = 2 * n * c * h * w * x.dtype.itemsize + shifts_flat.size * 4

    kernel = functools.partial(_shift_kernel, pad=pad, block=block, c=c, h=h, w=w)
    return pl.pallas_call(
        kernel,
        out_shape=jax.ShapeDtypeStruct((n, c, h, w), x.dtype),
        grid_spec=pltpu.PrefetchScalarGridSpec(
            num_scalar_prefetch=1,
            grid=(n // block,),
            in_specs=[pl.BlockSpec((block, c, h, w), lambda g, s: (g, 0, 0, 0))],
            out_specs=pl.BlockSpec((block, c, h, w), lambda g, s: (g, 0, 0, 0)),
        ),
        compiler_params=pltpu.CompilerParams(
            dimension_semantics=("parallel",),      # batch blocks are independent
            vmem_limit_bytes=32 * 1024 * 1024,
        ),
        cost_estimate=pl.CostEstimate(
            flops=flops, transcendentals=0, bytes_accessed=bytes_accessed),
    )(shifts_flat, x)


if __name__ == "__main__":
    pad = 4
    N, C, H, W = 2, 4, 16, 16

    key = jax.random.PRNGKey(0)
    kx, ks = jax.random.split(key)
    x = jax.random.normal(kx, (N, C, H, W), dtype=jnp.float32)
    # torch.randint(0, 2*pad + 1, (n, 1, 1, 2)) -> per-batch integer (sx, sy).
    shifts = jax.random.randint(ks, (N, 2), 0, 2 * pad + 1, dtype=jnp.int32)

    out = jax.block_until_ready(random_shifts_aug(x, shifts, pad))

    # Pure-JAX reference: replicate pad + integer crop (exact reduction of the
    # module's grid_sample for integer shifts).
    x_pad = jnp.pad(x, ((0, 0), (0, 0), (pad, pad), (pad, pad)), mode="edge")
    ref = jnp.stack([
        jax.lax.dynamic_slice(
            x_pad[b], (0, int(shifts[b, 1]), int(shifts[b, 0])), (C, H, W))
        for b in range(N)
    ])
    assert out.shape == (N, C, H, W) and out.dtype == x.dtype
    # Tolerance only covers MXU f32 multi-pass rounding in the selection
    # matmuls; a wrong shift would be off by O(1) at many pixels.
    assert jnp.allclose(out, ref, rtol=1e-3, atol=1e-3), "Pallas output mismatch vs reference"
    print("KERNEL_OK")
</pallas_src>

<mosaic_0001>
module attributes {stable_mosaic.version = 11 : i64} {
  func.func @_shift_kernel(%arg0: i32, %arg1: memref<4xi32, #tpu.memory_space<smem>>, %arg2: memref<1x4x16x16xf32, #tpu.memory_space<vmem>>, %arg3: memref<1x4x16x16xf32, #tpu.memory_space<vmem>>) attributes {dimension_semantics = [#tpu.dimension_semantics<parallel>], iteration_bounds = array<i64: 2>, scalar_prefetch = 1 : i64, scratch_operands = 0 : i64, tpu.core_type = #tpu.core_type<tc>, window_params = [{transform_indices = @transform_0, window_bounds = array<i64: 1, 4, 16, 16>}, {transform_indices = @transform_1, window_bounds = array<i64: 1, 4, 16, 16>}]} {
    %c1_i32 = arith.constant 1 : i32
    %0 = arith.muli %arg0, %c1_i32 : i32
    %1 = tpu.iota {dimensions = array<i32: 0>} : vector<16x16xi32>
    %2 = tpu.iota {dimensions = array<i32: 1>} : vector<16x16xi32>
    %3 = tpu.iota {dimensions = array<i32: 1>} : vector<16x16xi32>
    %4 = tpu.iota {dimensions = array<i32: 0>} : vector<16x16xi32>
    %c0_i32 = arith.constant 0 : i32
    %5 = arith.addi %0, %c0_i32 : i32
    %c2_i32 = arith.constant 2 : i32
    %6 = arith.muli %c2_i32, %5 : i32
    %7 = arith.index_cast %6 : i32 to index
    %8 = memref.load %arg1[%7] : memref<4xi32, #tpu.memory_space<smem>>
    %c0_i32_0 = arith.constant 0 : i32
    %9 = arith.addi %0, %c0_i32_0 : i32
    %c2_i32_1 = arith.constant 2 : i32
    %10 = arith.muli %c2_i32_1, %9 : i32
    %c1_i32_2 = arith.constant 1 : i32
    %11 = arith.addi %10, %c1_i32_2 : i32
    %12 = arith.index_cast %11 : i32 to index
    %13 = memref.load %arg1[%12] : memref<4xi32, #tpu.memory_space<smem>>
    %c4_i32 = arith.constant 4 : i32
    %14 = arith.subi %13, %c4_i32 : i32
    %c4_i32_3 = arith.constant 4 : i32
    %15 = arith.subi %8, %c4_i32_3 : i32
    %16 = vector.broadcast %14 : i32 to vector<16x16xi32>
    %17 = arith.addi %1, %16 : vector<16x16xi32>
    %c0_i32_4 = arith.constant 0 : i32
    %c15_i32 = arith.constant 15 : i32
    %18 = vector.broadcast %c0_i32_4 : i32 to vector<16x16xi32>
    %19 = arith.maxsi %18, %17 : vector<16x16xi32>
    %20 = vector.broadcast %c15_i32 : i32 to vector<16x16xi32>
    %21 = arith.minsi %20, %19 : vector<16x16xi32>
    %22 = arith.cmpi eq, %2, %21 : vector<16x16xi32>
    %23 = arith.extui %22 : vector<16x16xi1> to vector<16x16xi32>
    %24 = arith.sitofp %23 : vector<16x16xi32> to vector<16x16xf32>
    %25 = vector.broadcast %15 : i32 to vector<16x16xi32>
    %26 = arith.addi %3, %25 : vector<16x16xi32>
    %c0_i32_5 = arith.constant 0 : i32
    %c15_i32_6 = arith.constant 15 : i32
    %27 = vector.broadcast %c0_i32_5 : i32 to vector<16x16xi32>
    %28 = arith.maxsi %27, %26 : vector<16x16xi32>
    %29 = vector.broadcast %c15_i32_6 : i32 to vector<16x16xi32>
    %30 = arith.minsi %29, %28 : vector<16x16xi32>
    %31 = arith.cmpi eq, %4, %30 : vector<16x16xi32>
    %32 = arith.extui %31 : vector<16x16xi1> to vector<16x16xi32>
    %33 = arith.sitofp %32 : vector<16x16xi32> to vector<16x16xf32>
    %c0 = arith.constant 0 : index
    %c0_7 = arith.constant 0 : index
    %c0_8 = arith.constant 0 : index
    %c0_9 = arith.constant 0 : index
    %34 = vector.load %arg2[%c0, %c0_7, %c0_8, %c0_9] : memref<1x4x16x16xf32, #tpu.memory_space<vmem>>, vector<1x4x16x16xf32>
    %35 = vector.shape_cast %34 : vector<1x4x16x16xf32> to vector<4x16x16xf32>
    %36 = vector.shape_cast %35 : vector<4x16x16xf32> to vector<64x16xf32>
    %cst = arith.constant dense<0.000000e+00> : vector<64x16xf32>
    %37 = tpu.matmul %36, %33, %cst {dimension_numbers = #tpu.dot_dimension_numbers<[1], [0], [0], [1], [0, 0, 1, 1], [], []>} : vector<64x16xf32>, vector<16x16xf32>, vector<64x16xf32> -> vector<64x16xf32>
    %38 = vector.shape_cast %37 : vector<64x16xf32> to vector<4x16x16xf32>
    %39 = vector.extract_strided_slice %38 {offsets = [0, 0, 0], sizes = [1, 16, 16], strides = [1, 1, 1]} : vector<4x16x16xf32> to vector<1x16x16xf32>
    %40 = vector.shape_cast %39 : vector<1x16x16xf32> to vector<16x16xf32>
    %cst_10 = arith.constant dense<0.000000e+00> : vector<16x16xf32>
    %41 = tpu.matmul %24, %40, %cst_10 {dimension_numbers = #tpu.dot_dimension_numbers<[1], [0], [0], [1], [0, 0, 1, 1], [], []>} : vector<16x16xf32>, vector<16x16xf32>, vector<16x16xf32> -> vector<16x16xf32>
    %42 = vector.extract_strided_slice %38 {offsets = [1, 0, 0], sizes = [1, 16, 16], strides = [1, 1, 1]} : vector<4x16x16xf32> to vector<1x16x16xf32>
    %43 = vector.shape_cast %42 : vector<1x16x16xf32> to vector<16x16xf32>
    %cst_11 = arith.constant dense<0.000000e+00> : vector<16x16xf32>
    %44 = tpu.matmul %24, %43, %cst_11 {dimension_numbers = #tpu.dot_dimension_numbers<[1], [0], [0], [1], [0, 0, 1, 1], [], []>} : vector<16x16xf32>, vector<16x16xf32>, vector<16x16xf32> -> vector<16x16xf32>
    %45 = vector.extract_strided_slice %38 {offsets = [2, 0, 0], sizes = [1, 16, 16], strides = [1, 1, 1]} : vector<4x16x16xf32> to vector<1x16x16xf32>
    %46 = vector.shape_cast %45 : vector<1x16x16xf32> to vector<16x16xf32>
    %cst_12 = arith.constant dense<0.000000e+00> : vector<16x16xf32>
    %47 = tpu.matmul %24, %46, %cst_12 {dimension_numbers = #tpu.dot_dimension_numbers<[1], [0], [0], [1], [0, 0, 1, 1], [], []>} : vector<16x16xf32>, vector<16x16xf32>, vector<16x16xf32> -> vector<16x16xf32>
    %48 = vector.extract_strided_slice %38 {offsets = [3, 0, 0], sizes = [1, 16, 16], strides = [1, 1, 1]} : vector<4x16x16xf32> to vector<1x16x16xf32>
    %49 = vector.shape_cast %48 : vector<1x16x16xf32> to vector<16x16xf32>
    %cst_13 = arith.constant dense<0.000000e+00> : vector<16x16xf32>
    %50 = tpu.matmul %24, %49, %cst_13 {dimension_numbers = #tpu.dot_dimension_numbers<[1], [0], [0], [1], [0, 0, 1, 1], [], []>} : vector<16x16xf32>, vector<16x16xf32>, vector<16x16xf32> -> vector<16x16xf32>
    %51 = vector.shape_cast %41 : vector<16x16xf32> to vector<1x16x16xf32>
    %52 = vector.shape_cast %44 : vector<16x16xf32> to vector<1x16x16xf32>
    %53 = vector.shape_cast %47 : vector<16x16xf32> to vector<1x16x16xf32>
    %54 = vector.shape_cast %50 : vector<16x16xf32> to vector<1x16x16xf32>
    %55 = tpu.concatenate %51, %52, %53, %54 in 0 : vector<1x16x16xf32>, vector<1x16x16xf32>, vector<1x16x16xf32>, vector<1x16x16xf32> -> vector<4x16x16xf32>
    %c0_14 = arith.constant 0 : index
    %c0_15 = arith.constant 0 : index
    %c0_16 = arith.constant 0 : index
    %c0_17 = arith.constant 0 : index
    %56 = vector.load %arg3[%c0_14, %c0_15, %c0_16, %c0_17] : memref<1x4x16x16xf32, #tpu.memory_space<vmem>>, vector<1x4x16x16xf32>
    %57 = vector.shape_cast %56 : vector<1x4x16x16xf32> to vector<4x16x16xf32>
    %58 = vector.shape_cast %55 : vector<4x16x16xf32> to vector<1x4x16x16xf32>
    tpu.vector_store %arg3[%c0_14, %c0_15, %c0_16, %c0_17], %58 {strides = array<i32>} : memref<1x4x16x16xf32, #tpu.memory_space<vmem>>, vector<1x4x16x16xf32>,
    return
  }
  func.func @transform_0(%arg0: i32, %arg1: memref<4xi32, #tpu.memory_space<smem>>) -> (i32, i32, i32, i32) {
    %c0_i32 = arith.constant 0 : i32
    %c0_i32_0 = arith.constant 0 : i32
    %c0_i32_1 = arith.constant 0 : i32
    %c0_i32_2 = arith.constant 0 : i32
    return %arg0, %c0_i32, %c0_i32_0, %c0_i32_1 : i32, i32, i32, i32
  }
  func.func @transform_1(%arg0: i32, %arg1: memref<4xi32, #tpu.memory_space<smem>>) -> (i32, i32, i32, i32) {
    %c0_i32 = arith.constant 0 : i32
    %c0_i32_0 = arith.constant 0 : i32
    %c0_i32_1 = arith.constant 0 : i32
    %c0_i32_2 = arith.constant 0 : i32
    return %arg0, %c0_i32, %c0_i32_0, %c0_i32_1 : i32, i32, i32, i32
  }
}

</mosaic_0001>

<bundles_post_ra>
// kernel: tpu_custom_call.1
= control target key start
LH: loop header
LB: loop body
LE: loop exit
PB: predicated region body
PF: predicated region fallthrough
CT: control target
= control target key end

     0   :  { %s1250_s0 = inlined_call_operand.hbm [shape: s32[4], index: 0, kind: input, shape index: {}]   ;;  %s1251_s1 = inlined_call_operand.hbm [shape: f32[2,4,16,16], index: 1, kind: input, shape index: {}]   ;;  %s1252_s2 = inlined_call_operand.hbm [shape: f32[2,4,16,16], index: 2, kind: output, shape index: {}]  }
   0x1   :  { %s903_s11 = scalar_lea.hbm %s1250_s0, 16 }
   0x2   :  { %p904_p0 = scmp.ne.s32.totalorder %s1250_s0, %s903_s11  ;;  %p907_p1 = scmp.lt.u32.totalorder %s903_s11, %s1250_s0 }
   0x4   :  { %p909_p2 = pnand %p907_p1, %p904_p0 }
   0x6   :  { %912 = shalt.err (!%p909_p2)  }
   0x7   :  { %s1013_s16 = smov [#allocation3]  }
   0x8   :  { %8 = dma.hbm_to_smem %s1250_s0, 16, %s1013_s16, [#allocation2] }
   0x9   :  { %987 = dma.done.wait [#allocation2], 16 }
   0xa   :  { %988 = vsyncadd [#allocation2], 4294967280 }
   0xb   :  { %10 = sfence }
   0xc   :  { %11 = vsyncpa [#allocation5], 0 }
   0xd   :  { %13 = vsyncpa [#allocation5 + $0x1], 0 }
   0xe   :  { %14 = vsyncpa [#allocation6], 0 }
   0xf   :  { %16 = vsyncpa [#allocation6 + $0x1], 0  ;;  %s1049_s19 = smov 0   ;;  %s1051_s20 = smov 0  }
  0x10   :  { %s1053_s21 = smov 0   ;;  %s1055_s22 = smov 0  }
  0x11 LB: > { %s1070_s0 = sadd.s32 4294967295, %s1011_s22   ;;  %s719_s23 = sadd.s32 4294967294, %s1011_s22   ;;  %s1011_s22 = sphi %s1055_s22, %s1265_s22   ;;  %s1007_s21 = sphi %s1053_s21, %s1264_s21   ;;  %s1003_s20 = sphi %s1051_s20, %s1263_s20   ;;  %s999_s19 = sphi %s1049_s19, %s1262_s19  }
  0x12   : > { %s1074_s24 = sadd.s32 1, %s1011_s22   ;;  %s29_s25 = sadd.s32 1, %s1007_s21 }
  0x13   : > { %s26_s26 = ssub.s32 %s1011_s22, %s1074_s24  ;;  %p36_p3 = scmp.ne.s32.totalorder %s1007_s21, %s1003_s20 }
  0x14   : > { %p27_p4 = scmp.eq.s32.totalorder %s26_s26, 0  ;;  %p37_p5 = scmp.eq.s32.totalorder %s1011_s22, 0 }
  0x15   : > { %p42_p6 = scmp.ne.s32.totalorder %s1003_s20, %s999_s19  ;;  %p43_p7 = scmp.eq.s32.totalorder %s1070_s0, 0 }
  0x16   : > { %s1086_s27 = scalar_select %p27_p4, %s1007_s21, %s29_s25  }
  0x17   : > { %p1088_p8 = por %p37_p5, %p36_p3  ;;  %p1092_p9 = por %p43_p7, %p42_p6 }
  0x18   : > { %p66_p10 = scmp.eq.s32.totalorder %s1070_s0, 1  ;;  %p72_p11 = scmp.eq.s32.totalorder %s719_s23, 1 }
  0x19   : > { %p862_p13 = scmp.lt.s32.totalorder %s1011_s22, 2  ;;  %s92_s4 = sand.u32 1, %s1007_s21  }
  0x1a   : > { %p1099_p0 = por %p66_p10, %p36_p3  ;;  %p1103_p1 = por %p72_p11, %p42_p6 }
  0x1b   : > { %s758_s5 = sshll.u32 %s1011_s22, 10  ;;  %s722_s6 = sshll.u32 %s92_s4, 6 }
  0x1c   : > { %s1256_s30 = scalar_select %p1099_p0, 1, 0 }
  0x1d   : > { %s1257_s3 = scalar_select %p1103_p1, 1, 0 }
  0x1e   : > { %s1112_s9 = scalar_lea.hbm %s1251_s1, %s758_s5  ;;  %s96_s10 = scalar_lea.vmem [#allocation4], %s722_s6 }
  0x1f   : > { %s103_s11 = sshll.u32 %s96_s10, 4  ;;  %p1116_p2 = pnand %p862_p13, %p1088_p8  ;;  %s1120_s11 = int_to_ptr.vmem [resolvable:$true] %s103_s11 }
  0x20   : > { %s1122_s13 = scalar_lea.sflag [#allocation5], %s92_s4  ;;  %s913_s14 = scalar_lea.hbm %s1112_s9, 1024 }
  0x21   : > { %p914_p3 = scmp.ne.s32.totalorder %s1112_s9, %s913_s14  ;;  %p915_p4 = pneg %p1116_p2 }
  0x22   : > { %s918_s17 = scalar_lea.hbm %s1251_s1, 2048  ;;  %p919_p7 = scmp.lt.u32.totalorder %s1112_s9, %s1251_s1 }
  0x23   : > { %p916_p5 = pnand %p915_p4, %p914_p3  ;;  %p920_p8 = scmp.lt.u32.totalorder %s918_s17, %s913_s14 }
  0x24   : > { %p922_p11 = scmp.lt.u32.totalorder %s913_s14, %s1112_s9 }
  0x25   : > { %p917_p6 = pneg %p916_p5  ;;  %p921_p10 = por %p920_p8, %p919_p7 }
  0x27   : > { %p923_p13 = por %p922_p11, %p921_p10 }
  0x29   : > { %p924_p12 = pnand %p923_p13, %p917_p6 }
  0x2b   : > { %927 = shalt.err (!%p924_p12)
}
  0x2c   : > { %s928_s25 = scalar_lea.vmem %s1120_s11, 1024  ;;  %s1014_s26 = smov [#allocation4]  }
  0x2d   : > { %p929_p3 = scmp.ne.s32.totalorder %s1120_s11, %s928_s25  ;;  %s933_s28 = sshll.u32 %s1014_s26, 4  ;;  %s934_s28 = int_to_ptr.vmem [resolvable:$false] %s933_s28 }
  0x2e   : > { %s935_s4 = scalar_lea.vmem %s934_s28, 2048  ;;  %p936_p0 = scmp.lt.s32.totalorder %s1120_s11, %s934_s28 }
  0x2f   : > { %p931_p5 = pnand %p929_p3, %p915_p4  ;;  %p937_p7 = scmp.lt.s32.totalorder %s935_s4, %s928_s25 }
  0x31   : > { %p932_p1 = pneg %p931_p5  ;;  %p938_p8 = por %p937_p7, %p936_p0 }
  0x33   : > { %p939_p10 = pnand %p938_p8, %p932_p1 }
  0x35   : > { %942 = shalt.err (!%p939_p10)
}
  0x36   : > { %s1015_s5 = smov 128   ;;  %s1016_s6 = smov 8  }
  0x37   : > { %857 = dma.hbm_to_vmem [thread:$0]  (!%p1116_p2), %s1112_s9, 1024, %s1120_s11, %s1122_s13, %s1015_s5, %s1015_s5, %s1016_s6  }
  0x38   : > { %p725_p12 = scmp.ge.s32.totalorder %s1011_s22, 1  ;;  %p111_p4 = scmp.lt.s32.totalorder %s1011_s22, 3 }
  0x3a   : > { %p112_p6 = pnand %p725_p12, %p111_p4 }
  0x3b   : > { %s1153_s7 = sand.u32 (!%p112_p6), 1, %s1003_s20  }
  0x3c   : > { %115 = sbr.rel (%p112_p6) target bundleno = 548 (0x224), region = 24  ;;  %s726_s8 = sshll.u32 (!%p112_p6), %s1153_s7, 6 }
  0x3d   : > { %s118_s10 = scalar_lea.sflag (!%p112_p6), [#allocation5], %s1153_s7  ;;  %s1159_s14 = scalar_lea.vmem (!%p112_p6), [#allocation4], %s726_s8 }
  0x43   : > { %990 = dma.done.wait (%p1092_p9), %s118_s10, 1024  }
  0x44   : > { %992 = vsyncadd (%p1092_p9), %s118_s10, 4294966272  ;;  %s728_s9 = sshll.u32 %s1070_s0, 1  ;;  %v140_v0 = vlaneseq  ;;  %vm188_vm0 = vcmask 130048   ;;  %v180_v3 = vld [vmem:[%s1159_s14] sm:$0xff]  ;;  %v1017_v12 = vmov 1.0|1.0  }
  0x45   : > { %s146_s11 = sld [smem:[#allocation3 + %s728_s9]]  ;;  %s147_s12 = sadd.s32 1, %s728_s9  ;;  %790 = vmatprep.mubr.msk.f32.mxu0 %vm188_vm0, %v180_v3  ;;  %v181_v13 = vld [vmem:[%s1159_s14 + $0x8] sm:$0xff]  ;;  %v182_v14 = vld [vmem:[%s1159_s14 + $0x10] sm:$0xff]  ;;  %v183_v15 = vld [vmem:[%s1159_s14 + $0x18] sm:$0xff]  ;;  %v1018_v24 = vmov 0.0  }
  0x46   : > { %s148_s13 = sld [smem:[#allocation3 + %s147_s12]]  ;;  %v141_v1 = vshrl.u32 %v140_v0, 7  ;;  %v144_v2 = vand.u32 127, %v140_v0  ;;  %v184_v16 = vld [vmem:[%s1159_s14 + $0x20] sm:$0xff]  ;;  %v185_v17 = vld [vmem:[%s1159_s14 + $0x28] sm:$0xff]  ;;  %v186_v18 = vld [vmem:[%s1159_s14 + $0x30] sm:$0xff] }
  0x47   : > { %v187_v19 = vld [vmem:[%s1159_s14 + $0x38] sm:$0xff]  ;;  %s139_s29 = scalar_lea.vmem [#allocation7], %s726_s8  ;;  %s759_s18 = sshll.u32 %s1070_s0, 10 }
  0x48   : > { %v142_v4 = vadd.s32 8, %v141_v1  ;;  %s646_s17 = sshll.u32 %s139_s29, 4  ;;  %s1204_s26 = scalar_lea.hbm %s1252_s2, %s759_s18  ;;  %s1198_s17 = int_to_ptr.vmem [resolvable:$true] %s646_s17 }
  0x49   : > { %s633_s0 = scalar_lea.sflag [#allocation6], %s1153_s7  ;;  %s943_s28 = scalar_lea.vmem %s1198_s17, 1024 }
  0x4a   : > { %p944_p9 = scmp.ne.s32.totalorder %s1198_s17, %s943_s28  ;;  %p1259_p0 = scmp.ne.s32.totalorder %s1256_s30, 0 }
  0x4b   : > { %s730_s15 = sadd.s32 4294967292, %s146_s11  ;;  %s1019_s4 = smov [#allocation7]  }
  0x4c   : > { %s729_s16 = sadd.s32 4294967292, %s148_s13  ;;  %v168_v5 = vstv %s730_s15  ;;  %p945_p1 = pnand %p944_p9, %p1259_p0 }
  0x4d   : > { %v151_v6 = vstv %s729_s16  ;;  %v169_v7 = vadd.s32 %v168_v5, %v144_v2  ;;  %s947_s5 = sshll.u32 %s1019_s4, 4  ;;  %s948_s5 = int_to_ptr.vmem [resolvable:$false] %s947_s5 }
  0x4e   : > { %v152_v8 = vadd.s32 %v151_v6, %v141_v1  ;;  %v153_v9 = vadd.s32 %v151_v6, %v142_v4  ;;  %p946_p2 = pneg %p945_p1  ;;  %s949_s6 = scalar_lea.vmem %s948_s5, 2048 }
  0x4f   : > { %vm170_vm1 = vcmp.gt.s32.totalorder %v169_v7, 0  ;;  %p950_p11 = scmp.lt.s32.totalorder %s1198_s17, %s948_s5  ;;  %p951_p13 = scmp.lt.s32.totalorder %s949_s6, %s943_s28 }
  0x50   : > { %v171_v10 = vsel %vm170_vm1, %v169_v7, 0  ;;  %vm154_vm6 = vcmp.gt.s32.totalorder %v152_v8, 0  ;;  %vm156_vm7 = vcmp.gt.s32.totalorder %v153_v9, 0 }
  0x51   : > { %vm172_vm2 = vcmp.lt.s32.totalorder %v171_v10, 15  ;;  %v155_v20 = vsel %vm154_vm6, %v152_v8, 0  ;;  %v157_v21 = vsel %vm156_vm7, %v153_v9, 0  ;;  %p952_p3 = por %p951_p13, %p950_p11 }
  0x52   : > { %v173_v11 = vsel %vm172_vm2, %v171_v10, 15  ;;  %vm158_vm8 = vcmp.lt.s32.totalorder %v155_v20, 15  ;;  %vm160_vm9 = vcmp.lt.s32.totalorder %v157_v21, 15 }
  0x53   : > { %vm174_vm3 = vcmp.eq.s32.totalorder %v141_v1, %v173_v11  ;;  %vm175_vm4 = vcmp.eq.s32.totalorder %v142_v4, %v173_v11  ;;  %v159_v22 = vsel %vm158_vm8, %v155_v20, 15  ;;  %v161_v23 = vsel %vm160_vm9, %v157_v21, 15  ;;  %p953_p5 = pnand %p952_p3, %p946_p2 }
  0x54   : > { %vm830_vm5 = vmpackc.low %vm175_vm4, %vm174_vm3  ;;  %vm162_vm10 = vcmp.eq.s32.totalorder %v144_v2, %v159_v22  ;;  %vm163_vm11 = vcmp.eq.s32.totalorder %v144_v2, %v161_v23 }
  0x55   : > { %831 = vmatprep.subr.msk.bf16.mxu0 %vm830_vm5, %v1017_v12  ;;  %v731_v25 = vsel %vm162_vm10, 1.0, %v1018_v24  ;;  %v732_v26 = vsel %vm163_vm11, 1.0, %v1018_v24 }
  0x56   : > { %833 = vmatpush3.bf16.msk.msra.mxu0 %vm830_vm5, %v1017_v12  ;;  %806 = vmatprep.mubr.msk.f32.mxu1 %vm188_vm0, %v731_v25 }
  0x59   : > { %791 = vmatmul.mubr.msk.f32.vlgmr.msra.gmra.mrb[0].mxu0 %vm188_vm0, %v181_v13 }
  0x5a   : > { %793 = vmatprep.mubr.msk.f32.mxu0 %vm188_vm0, %v182_v14 }
  0x5d   : > { %794 = vmatmul.mubr.msk.f32.gmra.mrb[2].mxu0 %vm188_vm0, %v183_v15 }
  0x5e   : > { %796 = vmatprep.mubr.msk.f32.mxu0 %vm188_vm0, %v184_v16 }
  0x61   : > { %797 = vmatmul.mubr.msk.f32.gmra.mrb[4].mxu0 %vm188_vm0, %v185_v17 }
  0x62   : > { %799 = vmatprep.mubr.msk.f32.mxu0 %vm188_vm0, %v186_v18 }
  0x65   : > { %800 = vmatmul.mubr.msk.f32.gmra.mrb[6].mxu0 %vm188_vm0, %v187_v19 }
 0x12c   : > { %v792_v27 = vpop.f32.mrb[0].mxu0 }
 0x12d   : > { %v279_v28 = vpop.f32.mrb[1].mxu0 }
 0x12e   : > { %v834_v29 = vpack.c.bf16 %v792_v27, %v279_v28 }
 0x130   : > { %v795_v30 = vpop.f32.mrb[2].mxu0  ;;  %835 = vmatprep.subr.bf16.mxu1 %v834_v29 }
 0x131   : > { %v289_v31 = vpop.f32.mrb[3].mxu0  ;;  %837 = vmatpush3.bf16.msra.mxu1 %v834_v29 }
 0x132   : > { %v838_v32 = vpack.c.bf16 %v795_v30, %v289_v31 }
 0x134   : > { %v798_v33 = vpop.f32.mrb[4].mxu0  ;;  %807 = vmatmul.mubr.msk.f32.vlgmr.msra.gmra.mrb[0].mxu1 %vm188_vm0, %v732_v26  ;;  %839 = vmatprep.subr.bf16.mxu1 %v838_v32 }
 0x135   : > { %v299_v34 = vpop.f32.mrb[5].mxu0  ;;  %841 = vmatpush3.bf16.msra.mxu1 %v838_v32  ;;  %813 = vmatprep.mubr.msk.f32.mxu1 %vm188_vm0, %v731_v25 }
 0x136   : > { %v842_v35 = vpack.c.bf16 %v798_v33, %v299_v34 }
 0x138   : > { %v801_v36 = vpop.f32.mrb[6].mxu0  ;;  %814 = vmatmul.mubr.msk.f32.vlgmr.msra.gmra.mrb[2].mxu1 %vm188_vm0, %v732_v26  ;;  %843 = vmatprep.subr.bf16.mxu1 %v842_v35 }
 0x139   : > { %v309_v37 = vpop.f32.mrb[7].mxu0  ;;  %845 = vmatpush3.bf16.msra.mxu1 %v842_v35  ;;  %820 = vmatprep.mubr.msk.f32.mxu1 %vm188_vm0, %v731_v25 }
 0x13a   : > { %v846_v38 = vpack.c.bf16 %v801_v36, %v309_v37 }
 0x13c   : > { %821 = vmatmul.mubr.msk.f32.vlgmr.msra.gmra.mrb[4].mxu1 %vm188_vm0, %v732_v26  ;;  %847 = vmatprep.subr.bf16.mxu1 %v846_v38 }
 0x13d   : > { %849 = vmatpush3.bf16.msra.mxu1 %v846_v38  ;;  %827 = vmatprep.mubr.msk.f32.mxu1 %vm188_vm0, %v731_v25 }
 0x140   : > { %828 = vmatmul.mubr.msk.f32.vlgmr.msra.gmra.mrb[6].mxu1 %vm188_vm0, %v732_v26 }
 0x207   : > { %v808_v39 = vpop.f32.mrb[0].mxu1 }
 0x208   : > { %625 = vst.msk [vmem:[%s139_s29 + $0x8] sm:$0xff] %vm188_vm0, %v808_v39  ;;  %v390_v40 = vpop.f32.mrb[1].mxu1 }
 0x209   : > { %624 = vst.msk [vmem:[%s139_s29] sm:$0xff] %vm188_vm0, %v390_v40 }
 0x20b   : > { %v815_v41 = vpop.f32.mrb[2].mxu1 }
 0x20c   : > { %627 = vst.msk [vmem:[%s139_s29 + $0x18] sm:$0xff] %vm188_vm0, %v815_v41  ;;  %v465_v42 = vpop.f32.mrb[3].mxu1 }
 0x20d   : > { %626 = vst.msk [vmem:[%s139_s29 + $0x10] sm:$0xff] %vm188_vm0, %v465_v42 }
 0x20f   : > { %v822_v43 = vpop.f32.mrb[4].mxu1 }
 0x210   : > { %629 = vst.msk [vmem:[%s139_s29 + $0x28] sm:$0xff] %vm188_vm0, %v822_v43  ;;  %v540_v44 = vpop.f32.mrb[5].mxu1 }
 0x211   : > { %628 = vst.msk [vmem:[%s139_s29 + $0x20] sm:$0xff] %vm188_vm0, %v540_v44 }
 0x213   : > { %v829_v45 = vpop.f32.mrb[6].mxu1 }
 0x214   : > { %631 = vst.msk [vmem:[%s139_s29 + $0x38] sm:$0xff] %vm188_vm0, %v829_v45  ;;  %v615_v46 = vpop.f32.mrb[7].mxu1 }
 0x215   : > { %630 = vst.msk [vmem:[%s139_s29 + $0x30] sm:$0xff] %vm188_vm0, %v615_v46 }
 0x216   : > { %956 = shalt.err (!%p953_p5)
}
 0x217   : > { %s957_s8 = scalar_lea.hbm %s1204_s26, 1024  ;;  %s961_s9 = scalar_lea.hbm %s1252_s2, 2048 }
 0x218   : > { %p958_p7 = scmp.ne.s32.totalorder %s1204_s26, %s957_s8  ;;  %p962_p12 = scmp.lt.u32.totalorder %s1204_s26, %s1252_s2 }
 0x219   : > { %p963_p4 = scmp.lt.u32.totalorder %s961_s9, %s957_s8  ;;  %p965_p9 = scmp.lt.u32.totalorder %s957_s8, %s1204_s26 }
 0x21a   : > { %p959_p8 = pnand %p958_p7, %p1259_p0 }
 0x21b   : > { %p964_p6 = por %p963_p4, %p962_p12 }
 0x21c   : > { %p960_p10 = pneg %p959_p8 }
 0x21d   : > { %p966_p1 = por %p965_p9, %p964_p6 }
 0x21f   : > { %p967_p2 = pnand %p966_p1, %p960_p10 }
 0x221   : > { %970 = shalt.err (!%p967_p2)
}
 0x222   : > { %s1020_s13 = smov 128   ;;  %s1021_s15 = smov 8  }
 0x223   : > { %852 = dma.vmem_to_hbm [thread:$0]  (%p1259_p0), %s1198_s17, 1024, %s1204_s26, %s633_s0, %s1020_s13, %s1020_s13, %s1021_s15  }
 0x224 PF: > { %s661_s16 = sand.u32 1, %s999_s19   ;;  %p1260_p11 = scmp.ne.s32.totalorder %s1257_s3, 0 }
 0x225   : > { %p1261_p13 = scmp.ge.s32.totalorder %s1011_s22, 2  ;;  %s662_s29 = scalar_lea.sflag [#allocation6], %s661_s16 }
 0x227   : > { %p859_p3 = pnand %p1261_p13, %p1260_p11 }
 0x229   : > { %994 = dma.done.wait (!%p859_p3), %s662_s29, 1024  }
 0x22a   : > { %996 = vsyncadd (!%p859_p3), %s662_s29, 4294966272  ;;  %p19_p5 = scmp.ge.s32.totalorder %s1074_s24, 4   ;;  %s1262_s19 = smov %s1003_s20 }
 0x22b   : > { %s1263_s20 = smov %s1007_s21  ;;  %s1264_s21 = smov %s1086_s27 }
 0x22c   : > { %s1265_s22 = smov %s1074_s24  ;;  %21 = sbr.rel (!%p19_p5) target bundleno = 17 (0x11), region = 69 }
 0x233   :  { %667 = vsyncpa [#allocation5], 1 }
 0x234   :  { %669 = vsyncpa [#allocation5 + $0x1], 1 }
 0x235   :  { %670 = vsyncpa [#allocation6], 1 }
 0x236   :  { %672 = vsyncpa [#allocation6 + $0x1], 1 }

</bundles_post_ra>
